<compile_context>
chip_gen: v7x
topology: tpu7x:2x2x1
jax: 0.10.0
libtpu: 0.0.40
codegen_flags: <defaults>
</compile_context>

<pallas_src>
import jax
import jax.numpy as jnp
from jax.experimental import pallas as pl
from jax.experimental.pallas import tpu as pltpu

PAD = 2        # transformation 1: constant zero pad of the spatial dims
SHIFT_H = 1    # transformation 2: torch.roll shift along H
SHIFT_W = 2    # transformation 2: torch.roll shift along W
# transformation 3: per-channel affine (gamma, beta initialized in-script)

# The fused "beta-strip + offset windowed store" is only valid while no real
# pixel wraps around; with these constants that always holds.
assert 0 <= SHIFT_H <= PAD and 0 <= SHIFT_W <= PAD

OFF_H = PAD + SHIFT_H          # interior row offset in the output   (=3)
OFF_W = PAD + SHIFT_W          # interior col offset in the output   (=4)
BOT_H = PAD - SHIFT_H          # beta rows below the interior        (=1)
RIGHT_W = PAD - SHIFT_W        # beta cols right of the interior     (=0)


def _robustness_kernel(x_ref, gamma_ref, beta_ref, o_ref):
    # x_ref:     (1, cb, H,  W )  image block
    # gamma_ref: (1, cb, 1,  W )  per-channel scale, pre-broadcast to lane width
    # beta_ref:  (1, cb, 1,  Wp)  per-channel shift, pre-broadcast to lane width
    # o_ref:     (1, cb, Hp, Wp)
    _, cb, h, w = x_ref.shape
    _, _, hp, wp = o_ref.shape
    dt = o_ref.dtype

    g = gamma_ref[...]                       # (1, cb, 1, W)
    b = beta_ref[...]                        # (1, cb, 1, Wp)

    # ---- interior: pad->roll places the image at a static offset; one
    #      broadcast FMA, one full-row-width store (written exactly once) ----
    core = x_ref[...] * g + b[:, :, :, :w]
    o_ref[:, :, OFF_H:OFF_H + h, OFF_W:OFF_W + w] = core.astype(dt)

    # ---- border strips: affine(0) = beta[c].  Disjoint from the interior, so
    #      no output element is ever written twice (was: full fill + overwrite).
    o_ref[:, :, :OFF_H, :] = jnp.broadcast_to(b, (1, cb, OFF_H, wp)).astype(dt)
    if BOT_H > 0:
        o_ref[:, :, OFF_H + h:, :] = jnp.broadcast_to(
            b, (1, cb, BOT_H, wp)).astype(dt)
    if OFF_W > 0:
        o_ref[:, :, OFF_H:OFF_H + h, :OFF_W] = jnp.broadcast_to(
            b[:, :, :, :OFF_W], (1, cb, h, OFF_W)).astype(dt)
    if RIGHT_W > 0:
        o_ref[:, :, OFF_H:OFF_H + h, OFF_W + w:] = jnp.broadcast_to(
            b[:, :, :, :RIGHT_W], (1, cb, h, RIGHT_W)).astype(dt)


def _pick_c_block(n, c, spatial_elems, itemsize, vmem_budget=8 << 20):
    """Largest divisor of C whose double-buffered (in+out) block fits the budget,
    then shrunk (if possible) so there are >= 2 grid steps total (v7x dual-TC,
    pipeline overlap)."""
    divisors = sorted((d for d in range(1, c + 1) if c % d == 0), reverse=True)
    cb = 1
    for d in divisors:
        if 2 * d * spatial_elems * itemsize <= vmem_budget:
            cb = d
            break
    while n * (c // cb) < 2 and cb > 1:
        cb = max(d for d in divisors if d < cb)
    return cb


def transformation_robustness(x, gamma, beta):
    """x: (N, C, H, W).  Returns pad->roll->affine result, (N, C, H+2P, W+2P).

    Works in x.dtype end-to-end: pass bf16 on v6e/v7x for the bandwidth win,
    f32 on v5e.
    """
    n, c, h, w = x.shape
    hp, wp = h + 2 * PAD, w + 2 * PAD
    dt = x.dtype
    itemsize = jnp.dtype(dt).itemsize

    cb = _pick_c_block(n, c, h * w + hp * wp, itemsize)
    n_cblk = c // cb

    # Pre-broadcast affine params to lane width (sublane replicate only in-kernel).
    g4 = jnp.broadcast_to(gamma.astype(dt).reshape(1, c, 1, 1), (1, c, 1, w))
    b4 = jnp.broadcast_to(beta.astype(dt).reshape(1, c, 1, 1), (1, c, 1, wp))

    bytes_accessed = (n * c * (h * w + hp * wp) + c * (w + wp)) * itemsize
    cost = pl.CostEstimate(flops=2 * n * c * h * w, transcendentals=0,
                           bytes_accessed=bytes_accessed)

    return pl.pallas_call(
        _robustness_kernel,
        out_shape=jax.ShapeDtypeStruct((n, c, hp, wp), dt),
        grid=(n, n_cblk),
        in_specs=[
            pl.BlockSpec((1, cb, h, w), lambda i, j: (i, j, 0, 0)),    # x
            pl.BlockSpec((1, cb, 1, w), lambda i, j: (0, j, 0, 0)),    # gamma
            pl.BlockSpec((1, cb, 1, wp), lambda i, j: (0, j, 0, 0)),   # beta
        ],
        out_specs=pl.BlockSpec((1, cb, hp, wp), lambda i, j: (i, j, 0, 0)),
        compiler_params=pltpu.CompilerParams(
            dimension_semantics=("parallel", "parallel")),
        cost_estimate=cost,
    )(x, g4, b4)


def _reference(x, gamma, beta):
    xp = jnp.pad(x, ((0, 0), (0, 0), (PAD, PAD), (PAD, PAD)))
    xr = jnp.roll(xp, shift=(SHIFT_H, SHIFT_W), axis=(2, 3))
    return xr * gamma[None, :, None, None] + beta[None, :, None, None]


if __name__ == "__main__":
    key = jax.random.PRNGKey(0)
    N, C, H, W = 2, 4, 16, 16
    x = jax.random.normal(key, (N, C, H, W), dtype=jnp.float32)

    # Deterministic per-channel affine parameters.
    gamma = 1.0 + 0.1 * jnp.arange(C, dtype=jnp.float32)
    beta = 0.01 * jnp.arange(C, dtype=jnp.float32)

    out = jax.block_until_ready(transformation_robustness(x, gamma, beta))

    ref = _reference(x, gamma, beta)
    assert out.shape == (N, C, H + 2 * PAD, W + 2 * PAD), out.shape
    assert jnp.allclose(out, ref, atol=1e-6), "mismatch vs reference"

    print("KERNEL_OK")
</pallas_src>

<mosaic_0001>
module attributes {stable_mosaic.version = 11 : i64} {
  func.func @_robustness_kernel(%arg0: i32, %arg1: i32, %arg2: memref<1x4x16x16xf32, #tpu.memory_space<vmem>>, %arg3: memref<1x4x1x16xf32, #tpu.memory_space<vmem>>, %arg4: memref<1x4x1x20xf32, #tpu.memory_space<vmem>>, %arg5: memref<1x4x20x20xf32, #tpu.memory_space<vmem>>) attributes {dimension_semantics = [#tpu.dimension_semantics<parallel>, #tpu.dimension_semantics<parallel>], iteration_bounds = array<i64: 2, 1>, scalar_prefetch = 0 : i64, scratch_operands = 0 : i64, tpu.core_type = #tpu.core_type<tc>, window_params = [{transform_indices = @transform_0, window_bounds = array<i64: 1, 4, 16, 16>}, {transform_indices = @transform_1, window_bounds = array<i64: 1, 4, 1, 16>}, {transform_indices = @transform_2, window_bounds = array<i64: 1, 4, 1, 20>}, {transform_indices = @transform_3, window_bounds = array<i64: 1, 4, 20, 20>}]} {
    %c0 = arith.constant 0 : index
    %c0_0 = arith.constant 0 : index
    %c0_1 = arith.constant 0 : index
    %c0_2 = arith.constant 0 : index
    %0 = vector.load %arg3[%c0, %c0_0, %c0_1, %c0_2] : memref<1x4x1x16xf32, #tpu.memory_space<vmem>>, vector<1x4x1x16xf32>
    %c0_3 = arith.constant 0 : index
    %c0_4 = arith.constant 0 : index
    %c0_5 = arith.constant 0 : index
    %c0_6 = arith.constant 0 : index
    %1 = vector.load %arg4[%c0_3, %c0_4, %c0_5, %c0_6] : memref<1x4x1x20xf32, #tpu.memory_space<vmem>>, vector<1x4x1x20xf32>
    %c0_7 = arith.constant 0 : index
    %c0_8 = arith.constant 0 : index
    %c0_9 = arith.constant 0 : index
    %c0_10 = arith.constant 0 : index
    %2 = vector.load %arg2[%c0_7, %c0_8, %c0_9, %c0_10] : memref<1x4x16x16xf32, #tpu.memory_space<vmem>>, vector<1x4x16x16xf32>
    %3 = vector.broadcast %0 : vector<1x4x1x16xf32> to vector<1x4x16x16xf32>
    %4 = arith.mulf %2, %3 : vector<1x4x16x16xf32>
    %5 = vector.extract_strided_slice %1 {offsets = [0, 0, 0, 0], sizes = [1, 4, 1, 16], strides = [1, 1, 1, 1]} : vector<1x4x1x20xf32> to vector<1x4x1x16xf32>
    %6 = vector.broadcast %5 : vector<1x4x1x16xf32> to vector<1x4x16x16xf32>
    %7 = arith.addf %4, %6 : vector<1x4x16x16xf32>
    %c0_11 = arith.constant 0 : index
    %c0_12 = arith.constant 0 : index
    %c3 = arith.constant 3 : index
    %c4 = arith.constant 4 : index
    %8 = vector.load %arg5[%c0_11, %c0_12, %c3, %c4] : memref<1x4x20x20xf32, #tpu.memory_space<vmem>>, vector<1x4x16x16xf32>
    tpu.vector_store %arg5[%c0_11, %c0_12, %c3, %c4], %7 {strides = array<i32>} : memref<1x4x20x20xf32, #tpu.memory_space<vmem>>, vector<1x4x16x16xf32>,
    %9 = vector.shape_cast %1 : vector<1x4x1x20xf32> to vector<1x4x1x20xf32>
    %10 = vector.broadcast %9 : vector<1x4x1x20xf32> to vector<1x4x3x20xf32>
    %c0_13 = arith.constant 0 : index
    %c0_14 = arith.constant 0 : index
    %c0_15 = arith.constant 0 : index
    %c0_16 = arith.constant 0 : index
    %11 = vector.load %arg5[%c0_13, %c0_14, %c0_15, %c0_16] : memref<1x4x20x20xf32, #tpu.memory_space<vmem>>, vector<1x4x3x20xf32>
    tpu.vector_store %arg5[%c0_13, %c0_14, %c0_15, %c0_16], %10 {strides = array<i32>} : memref<1x4x20x20xf32, #tpu.memory_space<vmem>>, vector<1x4x3x20xf32>,
    %c0_17 = arith.constant 0 : index
    %c0_18 = arith.constant 0 : index
    %c19 = arith.constant 19 : index
    %c0_19 = arith.constant 0 : index
    %12 = vector.load %arg5[%c0_17, %c0_18, %c19, %c0_19] : memref<1x4x20x20xf32, #tpu.memory_space<vmem>>, vector<1x4x1x20xf32>
    tpu.vector_store %arg5[%c0_17, %c0_18, %c19, %c0_19], %1 {strides = array<i32>} : memref<1x4x20x20xf32, #tpu.memory_space<vmem>>, vector<1x4x1x20xf32>,
    %13 = vector.extract_strided_slice %1 {offsets = [0, 0, 0, 0], sizes = [1, 4, 1, 4], strides = [1, 1, 1, 1]} : vector<1x4x1x20xf32> to vector<1x4x1x4xf32>
    %14 = vector.shape_cast %13 : vector<1x4x1x4xf32> to vector<1x4x1x4xf32>
    %15 = vector.broadcast %14 : vector<1x4x1x4xf32> to vector<1x4x16x4xf32>
    %c0_20 = arith.constant 0 : index
    %c0_21 = arith.constant 0 : index
    %c3_22 = arith.constant 3 : index
    %c0_23 = arith.constant 0 : index
    %16 = vector.load %arg5[%c0_20, %c0_21, %c3_22, %c0_23] : memref<1x4x20x20xf32, #tpu.memory_space<vmem>>, vector<1x4x16x4xf32>
    tpu.vector_store %arg5[%c0_20, %c0_21, %c3_22, %c0_23], %15 {strides = array<i32>} : memref<1x4x20x20xf32, #tpu.memory_space<vmem>>, vector<1x4x16x4xf32>,
    return
  }
  func.func @transform_0(%arg0: i32, %arg1: i32) -> (i32, i32, i32, i32) {
    %c0_i32 = arith.constant 0 : i32
    %c0_i32_0 = arith.constant 0 : i32
    %c0_i32_1 = arith.constant 0 : i32
    return %arg0, %arg1, %c0_i32, %c0_i32_0 : i32, i32, i32, i32
  }
  func.func @transform_1(%arg0: i32, %arg1: i32) -> (i32, i32, i32, i32) {
    %c0_i32 = arith.constant 0 : i32
    %c0_i32_0 = arith.constant 0 : i32
    %c0_i32_1 = arith.constant 0 : i32
    %c0_i32_2 = arith.constant 0 : i32
    return %c0_i32, %arg1, %c0_i32_0, %c0_i32_1 : i32, i32, i32, i32
  }
  func.func @transform_2(%arg0: i32, %arg1: i32) -> (i32, i32, i32, i32) {
    %c0_i32 = arith.constant 0 : i32
    %c0_i32_0 = arith.constant 0 : i32
    %c0_i32_1 = arith.constant 0 : i32
    %c0_i32_2 = arith.constant 0 : i32
    return %c0_i32, %arg1, %c0_i32_0, %c0_i32_1 : i32, i32, i32, i32
  }
  func.func @transform_3(%arg0: i32, %arg1: i32) -> (i32, i32, i32, i32) {
    %c0_i32 = arith.constant 0 : i32
    %c0_i32_0 = arith.constant 0 : i32
    %c0_i32_1 = arith.constant 0 : i32
    return %arg0, %arg1, %c0_i32, %c0_i32_0 : i32, i32, i32, i32
  }
}

</mosaic_0001>

<bundles_post_ra>
// kernel: tpu_custom_call.1
= control target key start
LH: loop header
LB: loop body
LE: loop exit
PB: predicated region body
PF: predicated region fallthrough
CT: control target
= control target key end

     0   :  { %8 = vsyncpa [#allocation3], 0  ;;  %s993_s0 = inlined_call_operand.hbm [shape: f32[2,4,16,16], index: 0, kind: input, shape index: {}]   ;;  %s994_s1 = inlined_call_operand.hbm [shape: f32[1,4,1,16], index: 1, kind: input, shape index: {}]   ;;  %s995_s2 = inlined_call_operand.vmem [shape: f32[1,4,1,20], index: 2, kind: input, shape index: {}]   ;;  %s996_s3 = inlined_call_operand.vmem [shape: f32[2,4,20,20], index: 3, kind: output, shape index: {}]  }
   0x1   :  { %10 = vsyncpa [#allocation3 + $0x1], 0 }
   0x2   :  { %11 = vsyncpa [#allocation5], 0  ;;  %s763_s12 = smov 0   ;;  %s765_s13 = smov 0  }
   0x3   :  { %s767_s14 = smov 0   ;;  %s769_s15 = smov 0  }
   0x4   :  { %s771_s16 = smov 0   ;;  %s773_s17 = smov 0  }
   0x5 LB: > { %s530_s18 = sadd.s32 4294967295, %s734_s17   ;;  %p51_p0 = scmp.ne.s32.totalorder %s718_s13, %s714_s12  ;;  %s734_s17 = sphi %s773_s17, %s17_s17   ;;  %s730_s16 = sphi %s771_s16, %s1013_s16   ;;  %s726_s15 = sphi %s769_s15, %s1012_s15   ;;  %s722_s14 = sphi %s767_s14, %s1011_s14   ;;  %s718_s13 = sphi %s765_s13, %s1010_s13   ;;  %s714_s12 = sphi %s763_s12, %s1009_s12  }
   0x6   : > { %p793_p1 = scmp.eq.s32.totalorder %s530_s18, 0  ;;  %p532_p2 = scmp.ge.s32.totalorder %s734_s17, 1 }
   0x7   : > { %p142_p3 = scmp.lt.s32.totalorder %s734_s17, 3  ;;  %s736_s22 = smov [#allocation4]  }
   0x8   : > { %s1001_s19 = scalar_select %p793_p1, 1, 0 }
   0x9   : > { %p801_p4 = por %p793_p1, %p51_p0  ;;  %p805_p5 = pnand %p532_p2, %p142_p3 }
   0xa   : > { %s157_s23 = sshll.u32 %s736_s22, 4  ;;  %s29_s25 = sadd.s32 1, %s730_s16  ;;  %s158_s23 = int_to_ptr.vmem [resolvable:$true] %s157_s23 }
   0xb   : > { %s1002_s20 = scalar_select %p801_p4, 1, 0 }
   0xc   : > { %s1003_s21 = scalar_select %p805_p5, 1, 0 }
   0xd   : > { %p557_p6 = pneg %p805_p5  ;;  %s622_s28 = scalar_lea.hbm %s994_s1, 64 }
   0xe   : > { %p623_p8 = scmp.ne.s32.totalorder %s994_s1, %s622_s28  ;;  %p629_p12 = scmp.lt.u32.totalorder %s622_s28, %s994_s1 }
   0xf   : > { %p813_p7 = pnand %p557_p6, %p793_p1 }
  0x11   : > { %p624_p9 = pneg %p813_p7 }
  0x13   : > { %p625_p10 = pnand %p624_p9, %p623_p8 }
  0x15   : > { %p626_p11 = pneg %p625_p10 }
  0x17   : > { %p631_p13 = pnand %p629_p12, %p626_p11 }
  0x19   : > { %634 = shalt.err (!%p631_p13)
}
  0x1a   : > { %s635_s6 = scalar_lea.vmem %s158_s23, 64  ;;  %p643_p6 = scmp.lt.s32.totalorder %s158_s23, %s158_s23 }
  0x1b   : > { %p636_p0 = scmp.ne.s32.totalorder %s158_s23, %s635_s6  ;;  %p644_p1 = scmp.lt.s32.totalorder %s635_s6, %s635_s6 }
  0x1d   : > { %p638_p2 = pnand %p636_p0, %p624_p9  ;;  %p645_p4 = por %p644_p1, %p643_p6 }
  0x1f   : > { %p639_p3 = pneg %p638_p2 }
  0x21   : > { %p646_p5 = pnand %p645_p4, %p639_p3 }
  0x23   : > { %649 = shalt.err (!%p646_p5)
}
  0x24   : > { %s737_s7 = smov 16   ;;  %s738_s8 = smov 1  }
  0x25   : > { %560 = dma.hbm_to_vmem [thread:$0]  (!%p813_p7), %s994_s1, 64, %s158_s23, [#allocation5], %s737_s7, %s737_s7, %s738_s8  }
  0x26   : > { %p31_p1 = scmp.ge.s32.totalorder %s29_s25, 2  ;;  %s38_s11 = sadd.s32 1, %s722_s14 }
  0x27   : > { %p45_p4 = scmp.ne.s32.totalorder %s722_s14, %s718_s13  ;;  %p46_p5 = scmp.eq.s32.totalorder %s734_s17, 0 }
  0x28   : > { %s1015_s25 = smov (%p31_p1, %s29_s25), 0  ;;  %p566_p9 = scmp.lt.s32.totalorder %s734_s17, 2 }
  0x29   : > { %p47_p8 = por %p46_p5, %p45_p4  ;;  %s33_s12 = ssub.s32 %s730_s16, %s1015_s25 }
  0x2a   : > { %s179_s18 = sand.u32 1, %s722_s14   ;;  %p36_p10 = scmp.eq.s32.totalorder %s33_s12, 0 }
  0x2b   : > { %s536_s22 = sshll.u32 %s179_s18, 6  ;;  %s549_s26 = sshll.u32 %s730_s16, 10 }
  0x2c   : > { %s846_s27 = scalar_select %p36_p10, %s722_s14, %s38_s11  }
  0x2d   : > { %s851_s23 = scalar_lea.hbm %s993_s0, %s549_s26  ;;  %s183_s29 = scalar_lea.vmem [#allocation2], %s536_s22 }
  0x2e   : > { %s193_s30 = sshll.u32 %s183_s29, 4  ;;  %p853_p7 = pnand %p566_p9, %p47_p8  ;;  %s857_s30 = int_to_ptr.vmem [resolvable:$true] %s193_s30 }
  0x2f   : > { %s859_s5 = scalar_lea.sflag [#allocation3], %s179_s18  ;;  %s650_s6 = scalar_lea.hbm %s851_s23, 1024 }
  0x30   : > { %p651_p11 = scmp.ne.s32.totalorder %s851_s23, %s650_s6  ;;  %p652_p12 = pneg %p853_p7 }
  0x31   : > { %s655_s9 = scalar_lea.hbm %s993_s0, 2048  ;;  %p656_p2 = scmp.lt.u32.totalorder %s851_s23, %s993_s0 }
  0x32   : > { %p653_p13 = pnand %p652_p12, %p651_p11  ;;  %p657_p3 = scmp.lt.u32.totalorder %s655_s9, %s650_s6 }
  0x33   : > { %p659_p1 = scmp.lt.u32.totalorder %s650_s6, %s851_s23 }
  0x34   : > { %p654_p0 = pneg %p653_p13  ;;  %p658_p6 = por %p657_p3, %p656_p2 }
  0x36   : > { %p660_p4 = por %p659_p1, %p658_p6 }
  0x38   : > { %p661_p5 = pnand %p660_p4, %p654_p0 }
  0x3a   : > { %664 = shalt.err (!%p661_p5)
}
  0x3b   : > { %s665_s12 = scalar_lea.vmem %s857_s30, 1024  ;;  %s739_s18 = smov [#allocation2]  }
  0x3c   : > { %p666_p8 = scmp.ne.s32.totalorder %s857_s30, %s665_s12  ;;  %s670_s22 = sshll.u32 %s739_s18, 4  ;;  %s671_s22 = int_to_ptr.vmem [resolvable:$false] %s670_s22 }
  0x3d   : > { %s672_s26 = scalar_lea.vmem %s671_s22, 2048  ;;  %p673_p11 = scmp.lt.s32.totalorder %s857_s30, %s671_s22 }
  0x3e   : > { %p668_p9 = pnand %p666_p8, %p652_p12  ;;  %p674_p13 = scmp.lt.s32.totalorder %s672_s26, %s665_s12 }
  0x40   : > { %p669_p10 = pneg %p668_p9  ;;  %p675_p2 = por %p674_p13, %p673_p11 }
  0x42   : > { %p676_p3 = pnand %p675_p2, %p669_p10 }
  0x44   : > { %679 = shalt.err (!%p676_p3)
}
  0x45   : > { %s740_s24 = smov 128   ;;  %s741_s28 = smov 8  }
  0x46   : > { %564 = dma.hbm_to_vmem [thread:$0]  (!%p853_p7), %s851_s23, 1024, %s857_s30, %s859_s5, %s740_s24, %s740_s24, %s741_s28  }
  0x47   : > { %p1006_p12 = scmp.ne.s32.totalorder %s1003_s21, 0 }
  0x48   : > { %s207_s29 = sand.u32 (!%p1006_p12), 1, %s718_s13   ;;  %p1007_p0 = scmp.ne.s32.totalorder (!%p1006_p12), %s1002_s20, 0 }
  0x49   : > { %205 = sbr.rel (%p1006_p12) target bundleno = 223 (0xdf), region = 32  ;;  %s540_s6 = sshll.u32 (!%p1006_p12), %s207_s29, 6 }
  0x4a   : > { %s208_s7 = scalar_lea.sflag (!%p1006_p12), [#allocation3], %s207_s29  ;;  %s890_s8 = scalar_lea.vmem (!%p1006_p12), [#allocation2], %s540_s6 }
  0x50   : > { %705 = dma.done.wait (%p1007_p0), %s208_s7, 1024  }
  0x51   : > { %707 = vsyncadd (%p1007_p0), %s208_s7, 4294966272  ;;  %p1008_p6 = scmp.ne.s32.totalorder %s1001_s19, 0 }
  0x53   : > { %709 = dma.done.wait (%p1008_p6), [#allocation5], 64  }
  0x54   : > { %711 = vsyncadd (%p1008_p6), [#allocation5], 4294967232  ;;  %p255_p7 = scmp.lt.s32.totalorder %s726_s15, 1  ;;  %v317_v0 = vlaneseq  ;;  %vm391_vm0 = vcmask 155648   ;;  %v544_v3 = vld [vmem:[#allocation4 + $0x1] ss:$0 sm:$0xff] }
  0x55   : > { %v270_v4 = vld [vmem:[%s995_s2 + $0x1] sm:$0x1]  ;;  %v275_v5 = vld [vmem:[%s890_s8 + $0x10] sm:$0xff]  ;;  %vm386_vm1 = vcmask 157696   ;;  %v276_v6 = vld [vmem:[%s890_s8 + $0x18] sm:$0xff]  ;;  %s742_s18 = smov 4  }
  0x56   : > { %s1017_s15 = smov (!%p255_p7, %s726_s15), 1  ;;  %v318_v1 = vshrl.u32 %v317_v0, 7  ;;  %v307_v7 = vmul.f32 %v544_v3, %v275_v5  ;;  %v543_v9 = vld [vmem:[#allocation4] ss:$0 sm:$0xff]  ;;  %v308_v11 = vmul.f32 %v544_v3, %v276_v6  ;;  %v274_v13 = vld [vmem:[%s890_s8 + $0x8] sm:$0xff]  ;;  %v280_v29 = vld [vmem:[%s890_s8 + $0x38] sm:$0xff] }
  0x57   : > { %s550_s21 = smul.u32 96, %s1017_s15  ;;  %v269_v10 = vld [vmem:[%s995_s2] sm:$0x1]  ;;  %v545_v15 = vld [vmem:[#allocation4 + $0x2] ss:$0 sm:$0xff]  ;;  %v306_v18 = vmul.f32 %v543_v9, %v274_v13  ;;  %v278_v20 = vld [vmem:[%s890_s8 + $0x28] sm:$0xff] }
  0x58   : > { %v319_v2 = vsub.s32 0, %v318_v1  ;;  %v273_v12 = vld [vmem:[%s890_s8] sm:$0xff]  ;;  %v310_v26 = vmul.f32 %v545_v15, %v278_v20  ;;  %v279_v32 = vld [vmem:[%s890_s8 + $0x30] sm:$0xff]  ;;  %vm377_vm2 = vcmask 162848   ;;  %vm396_vm3 = vcmask 31744  }
  0x59   : > { %s905_s30 = scalar_lea.vmem %s996_s3, %s550_s21  ;;  %v305_v17 = vmul.f32 %v543_v9, %v273_v12  ;;  %v271_v19 = vld [vmem:[%s995_s2 + $0x2] sm:$0x1]  ;;  %v272_v23 = vld [vmem:[%s995_s2 + $0x3] sm:$0x1] }
  0x5a   : > { %v324_v8 = vrot.slane %v270_v4, %v319_v2  ;;  %393 = vst.msk [vmem:[%s905_s30 + $0x2b] sm:$0x1] %vm391_vm0, %v270_v4  ;;  %v320_v14 = vrot.slane %v269_v10, %v319_v2  ;;  %392 = vst.msk [vmem:[%s905_s30 + $0x13] sm:$0x1] %vm391_vm0, %v269_v10  ;;  %v328_v21 = vrot.slane %v271_v19, %v319_v2  ;;  %v277_v22 = vld [vmem:[%s890_s8 + $0x20] sm:$0xff] }
  0x5b   : > { %394 = vst.msk [vmem:[%s905_s30 + $0x43] sm:$0x1] %vm391_vm0, %v271_v19  ;;  %v332_v27 = vrot.slane %v272_v23, %v319_v2  ;;  %395 = vst.msk [vmem:[%s905_s30 + $0x5b] sm:$0x1] %vm391_vm0, %v272_v23  ;;  %v546_v28 = vld [vmem:[#allocation4 + $0x3] ss:$0 sm:$0xff]  ;;  %v309_v31 = vmul.f32 %v545_v15, %v277_v22 }
  0x5c   : > { %v339_v16 = vadd.f32 %v324_v8, %v307_v7  ;;  %388 = vst.msk [vmem:[%s905_s30 + $0x18] sm:$0x7] %vm386_vm1, %v324_v8  ;;  %387 = vst.msk [vmem:[%s905_s30] sm:$0x7] %vm386_vm1, %v320_v14  ;;  %v337_v24 = vadd.f32 %v320_v14, %v305_v17  ;;  %v340_v25 = vadd.f32 %v324_v8, %v308_v11 }
  0x5d   : > { %389 = vst.msk [vmem:[%s905_s30 + $0x30] sm:$0x7] %vm386_vm1, %v328_v21  ;;  %v338_v30 = vadd.f32 %v320_v14, %v306_v18  ;;  %390 = vst.msk [vmem:[%s905_s30 + $0x48] sm:$0x7] %vm386_vm1, %v332_v27  ;;  %v342_v33 = vadd.f32 %v328_v21, %v310_v26  ;;  %v312_v34 = vmul.f32 %v546_v28, %v280_v29 }
  0x5e   : > { %357 = vrot.lane.b32.xlu1 %v339_v16, %s742_s18  ;;  %353 = vrot.lane.b32.xlu0 %v337_v24, %s742_s18  ;;  %v341_v35 = vadd.f32 %v328_v21, %v309_v31  ;;  %v311_v36 = vmul.f32 %v546_v28, %v279_v32 }
  0x5f   : > { %v344_v37 = vadd.f32 %v332_v27, %v312_v34 }
  0x60   : > { %v343_v38 = vadd.f32 %v332_v27, %v311_v36 }
  0x62   : > { %359 = vrot.lane.b32.xlu1 %v340_v25, %s742_s18  ;;  %355 = vrot.lane.b32.xlu0 %v338_v30, %s742_s18 }
  0x66   : > { %363 = vrot.lane.b32.xlu1 %v342_v33, %s742_s18  ;;  %361 = vrot.lane.b32.xlu0 %v341_v35, %s742_s18 }
  0x6a   : > { %367 = vrot.lane.b32.xlu1 %v344_v37, %s742_s18  ;;  %365 = vrot.lane.b32.xlu0 %v343_v38, %s742_s18 }
  0xd0   : > { %v358_v39 = vpop.permute.xlu1 %357  ;;  %v354_v40 = vpop.permute.xlu0 %353 }
  0xd1   : > { %380 = vst.msk [vmem:[%s905_s30 + $0x1b] sm:$0xff] %vm377_vm2, %v358_v39  ;;  %378 = vst.msk [vmem:[%s905_s30 + $0x3] sm:$0xff] %vm377_vm2, %v354_v40 }
  0xd2   : > { %399 = vst.msk [vmem:[%s905_s30 + $0x1b] sm:$0xff] %vm396_vm3, %v324_v8  ;;  %397 = vst.msk [vmem:[%s905_s30 + $0x3] sm:$0xff] %vm396_vm3, %v320_v14 }
  0xd4   : > { %v360_v41 = vpop.permute.xlu1 %359  ;;  %v356_v42 = vpop.permute.xlu0 %355 }
  0xd5   : > { %381 = vst.msk [vmem:[%s905_s30 + $0x23] sm:$0xff] %vm377_vm2, %v360_v41  ;;  %379 = vst.msk [vmem:[%s905_s30 + $0xb] sm:$0xff] %vm377_vm2, %v356_v42 }
  0xd6   : > { %400 = vst.msk [vmem:[%s905_s30 + $0x23] sm:$0xff] %vm396_vm3, %v324_v8  ;;  %398 = vst.msk [vmem:[%s905_s30 + $0xb] sm:$0xff] %vm396_vm3, %v320_v14 }
  0xd8   : > { %v364_v43 = vpop.permute.xlu1 %363  ;;  %v362_v44 = vpop.permute.xlu0 %361 }
  0xd9   : > { %383 = vst.msk [vmem:[%s905_s30 + $0x3b] sm:$0xff] %vm377_vm2, %v364_v43  ;;  %382 = vst.msk [vmem:[%s905_s30 + $0x33] sm:$0xff] %vm377_vm2, %v362_v44 }
  0xda   : > { %402 = vst.msk [vmem:[%s905_s30 + $0x3b] sm:$0xff] %vm396_vm3, %v328_v21  ;;  %401 = vst.msk [vmem:[%s905_s30 + $0x33] sm:$0xff] %vm396_vm3, %v328_v21 }
  0xdc   : > { %v368_v45 = vpop.permute.xlu1 %367  ;;  %v366_v46 = vpop.permute.xlu0 %365 }
  0xdd   : > { %385 = vst.msk [vmem:[%s905_s30 + $0x53] sm:$0xff] %vm377_vm2, %v368_v45  ;;  %384 = vst.msk [vmem:[%s905_s30 + $0x4b] sm:$0xff] %vm377_vm2, %v366_v46 }
  0xde   : > { %404 = vst.msk [vmem:[%s905_s30 + $0x53] sm:$0xff] %vm396_vm3, %v332_v27  ;;  %403 = vst.msk [vmem:[%s905_s30 + $0x4b] sm:$0xff] %vm396_vm3, %v332_v27 }
  0xdf PF: > { %s17_s17 = sadd.s32 1, %s734_s17   ;;  %s1009_s12 = smov %s718_s13 }
  0xe0   : > { %p14_p1 = scmp.ge.s32.totalorder %s17_s17, 4   ;;  %s1010_s13 = smov %s722_s14 }
  0xe1   : > { %s1011_s14 = smov %s846_s27  ;;  %s1012_s15 = smov %s730_s16 }
  0xe2   : > { %s1013_s16 = smov %s1015_s25  ;;  %16 = sbr.rel (!%p14_p1) target bundleno = 5 (0x5), region = 80 }
  0xe9   :  { %437 = vsyncpa [#allocation3], 1 }
  0xea   :  { %439 = vsyncpa [#allocation3 + $0x1], 1 }
  0xeb   :  { %440 = vsyncpa [#allocation5], 1 }

</bundles_post_ra>
